<compile_context>
chip_gen: v6e
topology: v6e:2x2x1
jax: 0.10.0
libtpu: 0.0.40
codegen_flags: <defaults>
</compile_context>

<pallas_src>
import functools
import math

import jax
import jax.numpy as jnp
from jax import lax
from jax.experimental import pallas as pl
from jax.experimental.pallas import tpu as pltpu

_EPS = math.exp(-10)
_BARRIER_PAD = 20.0


def _roll_lanes(v, shift):
    """Static lane-axis roll of a 2D (rows, T) value; no-op when shift % T == 0."""
    T = v.shape[-1]
    s = shift % T
    if s == 0:
        return v
    return pltpu.roll(v, s, axis=v.ndim - 1)


def _lbp_kernel(x_ref, bpad_ref, o_ref, *, HL, alpha):
    """One (batch, channel-tile) block.

    x_ref   : (Cc, T)       input tile in native dtype (f32 accumulation inside)
    bpad_ref: (1, T + 2*HL) barrier padded with 20 along time (f32)
    o_ref   : (Cc, T)       output tile in x.dtype
    """
    Cc, T = x_ref.shape
    xv = x_ref[...].astype(jnp.float32)
    bp = bpad_ref[...].astype(jnp.float32)

    # Single transcendental pass over the (1, Tp) barrier row; all tap weights
    # are running products of shifted slices of `e`.
    e = jnp.exp(-alpha * bp)                           # (1, Tp)
    e0 = e[:, HL:HL + T]                               # center barrier factor (1, T)

    lane = lax.broadcasted_iota(jnp.int32, (1, T), 1)  # lane index along time

    num = xv                                           # center tap, weight exp(0) = 1
    den = jnp.ones((1, T), jnp.float32)

    # Left taps: offset -d, weight = prod_{i=0..d} exp(-alpha * b[t-i]).
    # Edge mask is folded into the (1,T) weight row (zeroed weight == zeroed x),
    # keeping full-tile VPU work to one multiply + one add per tap.
    w = e0
    for d in range(1, HL + 1):
        w = w * e[:, HL - d:HL - d + T]
        wm = jnp.where(lane >= d, w, 0.0)              # kill wrapped lanes
        num = num + _roll_lanes(xv, d) * wm            # x[t-d]
        den = den + w                                  # den keeps full weight (matches ref)

    # Right taps: offset +d, weight = prod_{i=0..d} exp(-alpha * b[t+i]).
    w = e0
    for d in range(1, HL + 1):
        w = w * e[:, HL + d:HL + d + T]
        wm = jnp.where(lane < T - d, w, 0.0)
        num = num + _roll_lanes(xv, -d) * wm           # x[t+d]
        den = den + w

    # One reciprocal on the (1, T) denominator row (EUP) + one Newton step
    # (safe: den >= 1 from the center weight), then a broadcast multiply.
    dpe = den + _EPS
    inv = pl.reciprocal(dpe, approx=True)
    inv = inv * (2.0 - dpe * inv)
    o_ref[...] = (num * inv).astype(o_ref.dtype)


def _vmem_capacity_bytes():
    """Per-core VMEM capacity; conservative 64 MiB fallback (v7x)."""
    try:
        return int(pltpu.get_tpu_info().vmem_capacity_bytes)
    except Exception:  # pragma: no cover - older jax / non-TPU tracing
        return 64 * 1024 * 1024


def _pick_channel_tile(C, Tpad, itemsize, vmem_cap, B):
    """Largest channel tile (multiple of the sublane pack, divisor of C) whose
    block footprint fits a VMEM budget, while trying to keep >=4 grid steps."""
    pack = max(8, 32 // itemsize)          # 8 for f32, 16 for bf16, 32 for 8-bit
    if C % pack != 0:
        return C                           # full-extent channel block
    # Footprint per channel row: double-buffered in + out tiles plus ~8
    # full-tile f32 compute temps (xv, num, rolled taps, ...).
    row_bytes = Tpad * (4 * itemsize + 8 * 4)
    budget = int(0.55 * vmem_cap)
    divisors = [d for d in range(pack, C + 1, pack) if C % d == 0]
    fitting = [d for d in divisors if d * row_bytes <= budget] or [pack]
    cc = fitting[-1]
    # Guarantee at least 4 parallel grid steps (v7x megacore) when possible.
    while B * (C // cc) < 4:
        smaller = [d for d in fitting if d < cc]
        if not smaller:
            break
        cc = smaller[-1]
    return cc


def local_barrier_pooling(x, barrier, *, kernel_size=7, alpha=0.2):
    """x: (B, C, T), barrier: (B, 1, T) (>= 0). Returns (B, C, T) in x.dtype."""
    B, C, T = x.shape
    K = int(kernel_size)
    if K % 2 != 1:
        raise ValueError("kernel_size must be odd (matches unfold_1d semantics)")
    HL = K // 2

    # Lane-dense time axis: pad T up to a multiple of 128 (only if needed) so
    # output stores are unmasked vst. Pad values x=0 / barrier=20 reproduce the
    # reference's out-of-range behaviour; the padded tail is sliced off.
    Tpad = -(-T // 128) * 128
    x_in = x if Tpad == T else jnp.pad(x, ((0, 0), (0, 0), (0, Tpad - T)))

    # Only the tiny (B, 1, T) barrier is halo-padded in HBM (value 20, as in
    # unfold_1d); x's halo is handled in-kernel with lane masks + rolls.
    b_pad = jnp.pad(barrier.astype(jnp.float32),
                    ((0, 0), (0, 0), (HL, HL + (Tpad - T))),
                    constant_values=_BARRIER_PAD)
    Tp = Tpad + 2 * HL

    itemsize = jnp.dtype(x.dtype).itemsize
    vmem_cap = _vmem_capacity_bytes()
    Cc = _pick_channel_tile(C, Tpad, itemsize, vmem_cap, B)
    grid = (B, C // Cc)

    # VMEM limit from actual need (double-buffered in/out tiles + barrier +
    # full-tile temps + margin), capped per generation (<= 75% of capacity:
    # ~48 MiB on v7x, ~96 MiB on v5e/v6e).
    blk_elems = Cc * Tpad
    need = 4 * blk_elems * itemsize + 2 * Tp * 4 + 8 * blk_elems * 4 + (4 << 20)
    vmem_limit = int(min(max(need, 32 << 20), int(0.75 * vmem_cap)))
    vmem_limit = max(vmem_limit, 16 << 20)

    # TODO(synk): for extreme T where even Cc=pack overflows the VMEM budget,
    # add a halo-aware time-tiled grid axis (manual DMA of the 2*HL halo).
    kernel = functools.partial(_lbp_kernel, HL=HL, alpha=float(alpha))

    out = pl.pallas_call(
        kernel,
        out_shape=jax.ShapeDtypeStruct((B, C, Tpad), x.dtype),
        grid=grid,
        in_specs=[
            pl.BlockSpec((None, Cc, Tpad), lambda b, c: (b, c, 0)),
            pl.BlockSpec((None, 1, Tp), lambda b, c: (b, 0, 0)),
        ],
        out_specs=pl.BlockSpec((None, Cc, Tpad), lambda b, c: (b, c, 0)),
        compiler_params=pltpu.CompilerParams(
            dimension_semantics=("parallel", "parallel"),
            vmem_limit_bytes=vmem_limit),
    )(x_in, b_pad)

    return out if Tpad == T else out[..., :T]


def _reference_lbp(x, barrier, kernel_size=7, alpha=0.2):
    """Pure-JAX reference mirroring the PyTorch unfold/cumsum formulation."""
    B, C, T = x.shape
    K = kernel_size
    HL = K // 2

    def unfold_1d(v, pad_value):
        vp = jnp.pad(v, ((0, 0), (0, 0), (HL, HL)), constant_values=pad_value)
        return jnp.stack([vp[:, :, k:k + T] for k in range(K)], axis=2)  # (B,C,K,T)

    xs = unfold_1d(x, 0.0)                      # (B, C, K, T)
    bu = unfold_1d(barrier, 20.0)               # (B, 1, K, T)
    left = jnp.flip(jnp.cumsum(jnp.flip(bu[:, :, :HL + 1, :], 2), axis=2), 2)[:, :, :-1, :]
    right = jnp.cumsum(bu[:, :, -HL - 1:, :], axis=2)[:, :, 1:, :]
    middle = jnp.zeros_like(bu[:, :, 0:1, :])
    w = jnp.exp(-(alpha * jnp.concatenate((left, middle, right), axis=2)))
    return (xs * w).sum(axis=2) / (w.sum(axis=2) + math.exp(-10))


if __name__ == "__main__":
    B, C, T = 2, 8, 128
    K = 7
    ALPHA = 0.2

    key = jax.random.PRNGKey(0)
    kx, kb = jax.random.split(key)
    x = jax.random.normal(kx, (B, C, T), dtype=jnp.float32)
    barrier = jax.nn.softplus(jax.random.normal(kb, (B, 1, T), dtype=jnp.float32))  # >= 0

    out = local_barrier_pooling(x, barrier, kernel_size=K, alpha=ALPHA)
    out = jax.block_until_ready(out)

    ref = _reference_lbp(x, barrier, kernel_size=K, alpha=ALPHA)
    assert out.shape == (B, C, T)
    assert jnp.allclose(out, ref, atol=1e-4, rtol=1e-4), float(jnp.max(jnp.abs(out - ref)))

    print("KERNEL_OK")
</pallas_src>

<mosaic_0001>
module attributes {stable_mosaic.version = 11 : i64} {
  func.func @_lbp_kernel(%arg0: i32, %arg1: i32, %arg2: memref<1x8x128xf32, #tpu.memory_space<vmem>>, %arg3: memref<1x1x134xf32, #tpu.memory_space<vmem>>, %arg4: memref<1x8x128xf32, #tpu.memory_space<vmem>>) attributes {dimension_semantics = [#tpu.dimension_semantics<parallel>, #tpu.dimension_semantics<parallel>], iteration_bounds = array<i64: 2, 1>, scalar_prefetch = 0 : i64, scratch_operands = 0 : i64, tpu.core_type = #tpu.core_type<tc>, window_params = [{transform_indices = @transform_0, window_bounds = array<i64: 1, 8, 128>}, {transform_indices = @transform_1, window_bounds = array<i64: 1, 1, 134>}, {transform_indices = @transform_2, window_bounds = array<i64: 1, 8, 128>}]} {
    %c0 = arith.constant 0 : index
    %c0_0 = arith.constant 0 : index
    %c0_1 = arith.constant 0 : index
    %0 = vector.load %arg2[%c0, %c0_0, %c0_1] : memref<1x8x128xf32, #tpu.memory_space<vmem>>, vector<1x8x128xf32>
    %1 = vector.shape_cast %0 : vector<1x8x128xf32> to vector<8x128xf32>
    %c0_2 = arith.constant 0 : index
    %c0_3 = arith.constant 0 : index
    %c0_4 = arith.constant 0 : index
    %2 = vector.load %arg3[%c0_2, %c0_3, %c0_4] : memref<1x1x134xf32, #tpu.memory_space<vmem>>, vector<1x1x134xf32>
    %3 = vector.shape_cast %2 : vector<1x1x134xf32> to vector<1x134xf32>
    %cst = arith.constant -2.000000e-01 : f32
    %4 = vector.broadcast %cst : f32 to vector<1x134xf32>
    %5 = arith.mulf %4, %3 : vector<1x134xf32>
    %6 = math.exp %5 : vector<1x134xf32>
    %7 = vector.extract_strided_slice %6 {offsets = [0, 3], sizes = [1, 128], strides = [1, 1]} : vector<1x134xf32> to vector<1x128xf32>
    %8 = tpu.iota {dimensions = array<i32: 1>} : vector<1x128xi32>
    %cst_5 = arith.constant 1.000000e+00 : f32
    %9 = vector.broadcast %cst_5 : f32 to vector<1x128xf32>
    %10 = vector.extract_strided_slice %6 {offsets = [0, 2], sizes = [1, 128], strides = [1, 1]} : vector<1x134xf32> to vector<1x128xf32>
    %11 = arith.mulf %7, %10 : vector<1x128xf32>
    %c1_i32 = arith.constant 1 : i32
    %12 = vector.broadcast %c1_i32 : i32 to vector<1x128xi32>
    %13 = arith.cmpi sge, %8, %12 : vector<1x128xi32>
    %cst_6 = arith.constant 0.000000e+00 : f32
    %14 = vector.broadcast %cst_6 : f32 to vector<1x128xf32>
    %15 = arith.select %13, %11, %14 : vector<1x128xi1>, vector<1x128xf32>
    %c1_i32_7 = arith.constant 1 : i32
    %16 = tpu.dynamic_rotate %1 by %c1_i32_7 dim 1 : vector<8x128xf32>, i32 -> vector<8x128xf32>
    %17 = vector.broadcast %15 : vector<1x128xf32> to vector<8x128xf32>
    %18 = arith.mulf %16, %17 : vector<8x128xf32>
    %19 = arith.addf %1, %18 : vector<8x128xf32>
    %20 = arith.addf %9, %11 : vector<1x128xf32>
    %21 = vector.extract_strided_slice %6 {offsets = [0, 1], sizes = [1, 128], strides = [1, 1]} : vector<1x134xf32> to vector<1x128xf32>
    %22 = arith.mulf %11, %21 : vector<1x128xf32>
    %c2_i32 = arith.constant 2 : i32
    %23 = vector.broadcast %c2_i32 : i32 to vector<1x128xi32>
    %24 = arith.cmpi sge, %8, %23 : vector<1x128xi32>
    %cst_8 = arith.constant 0.000000e+00 : f32
    %25 = vector.broadcast %cst_8 : f32 to vector<1x128xf32>
    %26 = arith.select %24, %22, %25 : vector<1x128xi1>, vector<1x128xf32>
    %c2_i32_9 = arith.constant 2 : i32
    %27 = tpu.dynamic_rotate %1 by %c2_i32_9 dim 1 : vector<8x128xf32>, i32 -> vector<8x128xf32>
    %28 = vector.broadcast %26 : vector<1x128xf32> to vector<8x128xf32>
    %29 = arith.mulf %27, %28 : vector<8x128xf32>
    %30 = arith.addf %19, %29 : vector<8x128xf32>
    %31 = arith.addf %20, %22 : vector<1x128xf32>
    %32 = vector.extract_strided_slice %6 {offsets = [0, 0], sizes = [1, 128], strides = [1, 1]} : vector<1x134xf32> to vector<1x128xf32>
    %33 = arith.mulf %22, %32 : vector<1x128xf32>
    %c3_i32 = arith.constant 3 : i32
    %34 = vector.broadcast %c3_i32 : i32 to vector<1x128xi32>
    %35 = arith.cmpi sge, %8, %34 : vector<1x128xi32>
    %cst_10 = arith.constant 0.000000e+00 : f32
    %36 = vector.broadcast %cst_10 : f32 to vector<1x128xf32>
    %37 = arith.select %35, %33, %36 : vector<1x128xi1>, vector<1x128xf32>
    %c3_i32_11 = arith.constant 3 : i32
    %38 = tpu.dynamic_rotate %1 by %c3_i32_11 dim 1 : vector<8x128xf32>, i32 -> vector<8x128xf32>
    %39 = vector.broadcast %37 : vector<1x128xf32> to vector<8x128xf32>
    %40 = arith.mulf %38, %39 : vector<8x128xf32>
    %41 = arith.addf %30, %40 : vector<8x128xf32>
    %42 = arith.addf %31, %33 : vector<1x128xf32>
    %43 = vector.extract_strided_slice %6 {offsets = [0, 4], sizes = [1, 128], strides = [1, 1]} : vector<1x134xf32> to vector<1x128xf32>
    %44 = arith.mulf %7, %43 : vector<1x128xf32>
    %c127_i32 = arith.constant 127 : i32
    %45 = vector.broadcast %c127_i32 : i32 to vector<1x128xi32>
    %46 = arith.cmpi slt, %8, %45 : vector<1x128xi32>
    %cst_12 = arith.constant 0.000000e+00 : f32
    %47 = vector.broadcast %cst_12 : f32 to vector<1x128xf32>
    %48 = arith.select %46, %44, %47 : vector<1x128xi1>, vector<1x128xf32>
    %c127_i32_13 = arith.constant 127 : i32
    %49 = tpu.dynamic_rotate %1 by %c127_i32_13 dim 1 : vector<8x128xf32>, i32 -> vector<8x128xf32>
    %50 = vector.broadcast %48 : vector<1x128xf32> to vector<8x128xf32>
    %51 = arith.mulf %49, %50 : vector<8x128xf32>
    %52 = arith.addf %41, %51 : vector<8x128xf32>
    %53 = arith.addf %42, %44 : vector<1x128xf32>
    %54 = vector.extract_strided_slice %6 {offsets = [0, 5], sizes = [1, 128], strides = [1, 1]} : vector<1x134xf32> to vector<1x128xf32>
    %55 = arith.mulf %44, %54 : vector<1x128xf32>
    %c126_i32 = arith.constant 126 : i32
    %56 = vector.broadcast %c126_i32 : i32 to vector<1x128xi32>
    %57 = arith.cmpi slt, %8, %56 : vector<1x128xi32>
    %cst_14 = arith.constant 0.000000e+00 : f32
    %58 = vector.broadcast %cst_14 : f32 to vector<1x128xf32>
    %59 = arith.select %57, %55, %58 : vector<1x128xi1>, vector<1x128xf32>
    %c126_i32_15 = arith.constant 126 : i32
    %60 = tpu.dynamic_rotate %1 by %c126_i32_15 dim 1 : vector<8x128xf32>, i32 -> vector<8x128xf32>
    %61 = vector.broadcast %59 : vector<1x128xf32> to vector<8x128xf32>
    %62 = arith.mulf %60, %61 : vector<8x128xf32>
    %63 = arith.addf %52, %62 : vector<8x128xf32>
    %64 = arith.addf %53, %55 : vector<1x128xf32>
    %65 = vector.extract_strided_slice %6 {offsets = [0, 6], sizes = [1, 128], strides = [1, 1]} : vector<1x134xf32> to vector<1x128xf32>
    %66 = arith.mulf %55, %65 : vector<1x128xf32>
    %c125_i32 = arith.constant 125 : i32
    %67 = vector.broadcast %c125_i32 : i32 to vector<1x128xi32>
    %68 = arith.cmpi slt, %8, %67 : vector<1x128xi32>
    %cst_16 = arith.constant 0.000000e+00 : f32
    %69 = vector.broadcast %cst_16 : f32 to vector<1x128xf32>
    %70 = arith.select %68, %66, %69 : vector<1x128xi1>, vector<1x128xf32>
    %c125_i32_17 = arith.constant 125 : i32
    %71 = tpu.dynamic_rotate %1 by %c125_i32_17 dim 1 : vector<8x128xf32>, i32 -> vector<8x128xf32>
    %72 = vector.broadcast %70 : vector<1x128xf32> to vector<8x128xf32>
    %73 = arith.mulf %71, %72 : vector<8x128xf32>
    %74 = arith.addf %63, %73 : vector<8x128xf32>
    %75 = arith.addf %64, %66 : vector<1x128xf32>
    %cst_18 = arith.constant 4.5399931E-5 : f32
    %76 = vector.broadcast %cst_18 : f32 to vector<1x128xf32>
    %77 = arith.addf %75, %76 : vector<1x128xf32>
    %78 = tpu.reciprocal %77 {approx = true} : vector<1x128xf32> -> vector<1x128xf32>
    %79 = arith.mulf %77, %78 : vector<1x128xf32>
    %cst_19 = arith.constant 2.000000e+00 : f32
    %80 = vector.broadcast %cst_19 : f32 to vector<1x128xf32>
    %81 = arith.subf %80, %79 : vector<1x128xf32>
    %82 = arith.mulf %78, %81 : vector<1x128xf32>
    %83 = vector.broadcast %82 : vector<1x128xf32> to vector<8x128xf32>
    %84 = arith.mulf %74, %83 : vector<8x128xf32>
    %c0_20 = arith.constant 0 : index
    %c0_21 = arith.constant 0 : index
    %c0_22 = arith.constant 0 : index
    %85 = vector.load %arg4[%c0_20, %c0_21, %c0_22] : memref<1x8x128xf32, #tpu.memory_space<vmem>>, vector<1x8x128xf32>
    %86 = vector.shape_cast %85 : vector<1x8x128xf32> to vector<8x128xf32>
    %87 = vector.shape_cast %84 : vector<8x128xf32> to vector<1x8x128xf32>
    tpu.vector_store %arg4[%c0_20, %c0_21, %c0_22], %87 {strides = array<i32>} : memref<1x8x128xf32, #tpu.memory_space<vmem>>, vector<1x8x128xf32>,
    return
  }
  func.func @transform_0(%arg0: i32, %arg1: i32) -> (i32, i32, i32) {
    %c0_i32 = arith.constant 0 : i32
    %c0_i32_0 = arith.constant 0 : i32
    return %arg0, %arg1, %c0_i32 : i32, i32, i32
  }
  func.func @transform_1(%arg0: i32, %arg1: i32) -> (i32, i32, i32) {
    %c0_i32 = arith.constant 0 : i32
    %c0_i32_0 = arith.constant 0 : i32
    %c0_i32_1 = arith.constant 0 : i32
    return %arg0, %c0_i32, %c0_i32_0 : i32, i32, i32
  }
  func.func @transform_2(%arg0: i32, %arg1: i32) -> (i32, i32, i32) {
    %c0_i32 = arith.constant 0 : i32
    %c0_i32_0 = arith.constant 0 : i32
    return %arg0, %arg1, %c0_i32 : i32, i32, i32
  }
}

</mosaic_0001>

<bundles_post_ra>
// kernel: tpu_custom_call.1
= control target key start
LH: loop header
LB: loop body
LE: loop exit
PB: predicated region body
PF: predicated region fallthrough
CT: control target
= control target key end

     0   :  { %7 = vsyncpa [#allocation3], 0  ;;  %s1052_s0 = inlined_call_operand.hbm [shape: f32[2,8,128], index: 0, kind: input, shape index: {}]   ;;  %s1053_s1 = inlined_call_operand.hbm [shape: f32[2,1,134], index: 1, kind: input, shape index: {}]   ;;  %s1054_s2 = inlined_call_operand.hbm [shape: f32[2,8,128], index: 2, kind: output, shape index: {}]  }
   0x1   :  { %9 = vsyncpa [#allocation3 + $0x1], 0 }
   0x2   :  { %10 = vsyncpa [#allocation6], 0 }
   0x3   :  { %12 = vsyncpa [#allocation6 + $0x1], 0 }
   0x4   :  { %13 = vsyncpa [#allocation4], 0 }
   0x5   :  { %15 = vsyncpa [#allocation4 + $0x1], 0  ;;  %s821_s9 = smov 0   ;;  %s823_s10 = smov 0  }
   0x6   :  { %s825_s11 = smov 0   ;;  %s827_s12 = smov 0  }
   0x7   :  { %s829_s13 = smov 0   ;;  %s831_s14 = smov 0  }
   0x8 LB: > { %s560_s15 = sadd.s32 4294967295, %s795_s14   ;;  %s561_s16 = sadd.s32 4294967294, %s795_s14   ;;  %s795_s14 = sphi %s831_s14, %s21_s14   ;;  %s791_s13 = sphi %s829_s13, %s1066_s13   ;;  %s787_s12 = sphi %s827_s12, %s1065_s12   ;;  %s783_s11 = sphi %s825_s11, %s1064_s11   ;;  %s779_s10 = sphi %s823_s10, %s1063_s10   ;;  %s775_s9 = sphi %s821_s9, %s1062_s9  }
   0x9   : > { %s33_s17 = sadd.s32 1, %s791_s13  ;;  %s42_s18 = sadd.s32 1, %s783_s11 }
   0xa   : > { %p35_p0 = scmp.ge.s32.totalorder %s33_s17, 2  ;;  %p49_p1 = scmp.ne.s32.totalorder %s783_s11, %s779_s10 }
   0xb   : > { %p50_p2 = scmp.eq.s32.totalorder %s795_s14, 0  ;;  %p55_p3 = scmp.ne.s32.totalorder %s779_s10, %s775_s9 }
   0xc   : > { %s1068_s17 = smov (%p35_p0, %s33_s17), 0  ;;  %p56_p5 = scmp.eq.s32.totalorder %s560_s15, 0 }
   0xd   : > { %p862_p4 = por %p50_p2, %p49_p1  ;;  %s37_s20 = ssub.s32 %s791_s13, %s1068_s17 }
   0xe   : > { %p107_p6 = scmp.eq.s32.totalorder %s560_s15, 1  ;;  %p40_p7 = scmp.eq.s32.totalorder %s37_s20, 0 }
   0xf   : > { %p868_p8 = por %p56_p5, %p55_p3  ;;  %p113_p10 = scmp.eq.s32.totalorder %s561_s16, 1 }
  0x10   : > { %p872_p9 = por %p107_p6, %p49_p1  ;;  %p595_p13 = scmp.lt.s32.totalorder %s795_s14, 2 }
  0x11   : > { %s877_s23 = scalar_select %p40_p7, %s783_s11, %s42_s18  }
  0x12   : > { %p879_p11 = por %p113_p10, %p55_p3  ;;  %s886_s25 = sand.u32 1, %s783_s11  }
  0x13   : > { %s564_s26 = sshll.u32 %s886_s25, 3  ;;  %s565_s27 = sshll.u32 %s791_s13, 7 }
  0x14   : > { %s143_s30 = scalar_lea.hbm %s1052_s0, %s565_s27  ;;  %s137_s3 = scalar_lea.vmem [#allocation2], %s564_s26 }
  0x15   : > { %s145_s4 = sshll.u32 %s137_s3, 4  ;;  %p895_p0 = pnand %p595_p13, %p862_p4  ;;  %s146_s4 = int_to_ptr.vmem [resolvable:$true] %s145_s4 }
  0x16   : > { %p569_p1 = scmp.ge.s32.totalorder %s795_s14, 1  ;;  %p169_p2 = scmp.lt.s32.totalorder %s795_s14, 3 }
  0x17   : > { %s134_s6 = scalar_lea.sflag [#allocation3], %s886_s25  ;;  %p657_p3 = pneg %p895_p0 }
  0x18   : > { %s668_s7 = scalar_lea.vmem %s146_s4, 128  ;;  %s797_s8 = smov [#allocation2]  }
  0x19   : > { %p669_p5 = scmp.ne.s32.totalorder %s146_s4, %s668_s7  ;;  %s673_s15 = sshll.u32 %s797_s8, 4  ;;  %s674_s15 = int_to_ptr.vmem [resolvable:$false] %s673_s15 }
  0x1a   : > { %s675_s16 = scalar_lea.vmem %s674_s15, 256  ;;  %p676_p4 = scmp.lt.s32.totalorder %s146_s4, %s674_s15 }
  0x1b   : > { %p671_p6 = pnand %p669_p5, %p657_p3  ;;  %p677_p10 = scmp.lt.s32.totalorder %s675_s16, %s668_s7 }
  0x1d   : > { %p672_p7 = pneg %p671_p6  ;;  %p678_p13 = por %p677_p10, %p676_p4 }
  0x1f   : > { %p679_p12 = pnand %p678_p13, %p672_p7 }
  0x21   : > { %682 = shalt.err (!%p679_p12)
}
  0x22   : > { %587 = dma.hbm_to_vmem [thread:$0]  (!%p895_p0), %s143_s30, 128, %s146_s4, %s134_s6  }
  0x23   : > { %p913_p5 = pnand %p569_p1, %p169_p2  ;;  %s566_s19 = sshll.u32 %s886_s25, 1 }
  0x24   : > { %s577_s20 = sshll.u32 %s791_s13, 5  ;;  %s156_s29 = scalar_lea.vmem [#allocation5], %s566_s19 }
  0x25   : > { %s162_s28 = scalar_lea.hbm %s1053_s1, %s577_s20  ;;  %s164_s3 = sshll.u32 %s156_s29, 4  ;;  %s165_s3 = int_to_ptr.vmem [resolvable:$true] %s164_s3 }
  0x26   : > { %s153_s7 = scalar_lea.sflag [#allocation6], %s886_s25  ;;  %s696_s8 = scalar_lea.vmem %s165_s3, 32 }
  0x27   : > { %p697_p12 = scmp.ne.s32.totalorder %s165_s3, %s696_s8  ;;  %s798_s30 = smov [#allocation5]  }
  0x28   : > { %s701_s4 = sshll.u32 %s798_s30, 4  ;;  %s702_s4 = int_to_ptr.vmem [resolvable:$false] %s701_s4 }
  0x29   : > { %p699_p6 = pnand %p697_p12, %p657_p3  ;;  %s703_s6 = scalar_lea.vmem %s702_s4, 64 }
  0x2a   : > { %p704_p1 = scmp.lt.s32.totalorder %s165_s3, %s702_s4  ;;  %p705_p2 = scmp.lt.s32.totalorder %s703_s6, %s696_s8 }
  0x2b   : > { %p700_p7 = pneg %p699_p6 }
  0x2c   : > { %p706_p4 = por %p705_p2, %p704_p1 }
  0x2e   : > { %p707_p10 = pnand %p706_p4, %p700_p7 }
  0x30   : > { %710 = shalt.err (!%p707_p10)
}
  0x31   : > { %590 = dma.hbm_to_vmem [thread:$0]  (!%p895_p0), %s162_s28, 32, %s165_s3, %s153_s7  }
  0x32   : > { %173 = sbr.rel (%p913_p5) target bundleno = 367 (0x16f), region = 28  ;;  %s931_s25 = sand.u32 (!%p913_p5), 1, %s779_s10  }
  0x33   : > { %s570_s15 = sshll.u32 (!%p913_p5), %s931_s25, 3  ;;  %s176_s16 = scalar_lea.sflag (!%p913_p5), [#allocation3], %s931_s25 }
  0x34   : > { %s179_s19 = scalar_lea.vmem (!%p913_p5), [#allocation2], %s570_s15 }
  0x37   : > { %762 = dma.done.wait (%p868_p8), %s176_s16, 128  }
  0x38   : > { %764 = vsyncadd (%p868_p8), %s176_s16, 4294967168  ;;  %s571_s5 = sshll.u32 %s931_s25, 1  ;;  %s185_s18 = scalar_lea.sflag [#allocation6], %s931_s25 }
  0x39   : > { %s188_s20 = scalar_lea.vmem [#allocation5], %s571_s5 }
  0x3a   : > { %766 = dma.done.wait (%p868_p8), %s185_s18, 32  }
  0x3b   : > { %768 = vsyncadd (%p868_p8), %s185_s18, 4294967264  ;;  %v215_v0 = vld [vmem:[%s188_s20] sm:$0x3]  ;;  %s799_s26 = smov 3   ;;  %s800_s27 = smov 1   ;;  %v950_v4 = vld [vmem:[%s179_s19] sm:$0xff]  ;;  %v219_v5 = vlaneseq }
  0x3c   : > { %v216_v1 = vmul.f32 -0.2, %v215_v0  ;;  %s801_s28 = smov 127   ;;  %s802_s29 = smov 2   ;;  %vm225_vm0 = vcmask 7168   ;;  %vm325_vm1 = vcmask 1039360  }
  0x3d   : > { %s803_s3 = smov 126   ;;  %s804_s7 = smov 125   ;;  %v232_v6 = vshrl.u32 %v219_v5, 7  ;;  %vm259_vm2 = vcmask 15360   ;;  %vm292_vm3 = vcmask 23552   ;;  %vm358_vm4 = vcmask 1031168  }
  0x3e   : > { %v217_v2 = vmul.f32 1.442695, %v216_v1  ;;  %vm243_vm5 = vcmask 1022976   ;;  %v220_v63 = vand.u32 127, %v219_v5  ;;  %s574_s21 = sshll.u32 %s787_s12, 7  ;;  %s213_s8 = scalar_lea.vmem [#allocation7], %s570_s15 }
  0x3f   : > { %v956_v10 = vsub.s32 0, %v232_v6  ;;  %v958_v11 = vsub.s32 1, %v232_v6  ;;  %s457_s30 = sshll.u32 %s213_s8, 4  ;;  %s455_s16 = scalar_lea.hbm %s1054_s2, %s574_s21  ;;  %s458_s30 = int_to_ptr.vmem [resolvable:$true] %s457_s30 }
  0x40   : > { %651 = vpow2.f32 %v217_v2  ;;  %vm229_vm6 = vcmp.ge.s32.totalorder %v220_v63, 1  ;;  %vm263_vm7 = vcmp.ge.s32.totalorder %v220_v63, 2  ;;  %vm296_vm8 = vcmp.ge.s32.totalorder %v220_v63, 3  ;;  %s443_s19 = scalar_lea.sflag [#allocation4], %s931_s25  ;;  %s711_s5 = scalar_lea.vmem %s458_s30, 128 }
  0x41   : > { %vm329_vm9 = vcmp.lt.s32.totalorder %v220_v63, 127  ;;  %vm362_vm10 = vcmp.lt.s32.totalorder %v220_v63, 126  ;;  %vm394_vm11 = vcmp.lt.s32.totalorder %v220_v63, 125  ;;  %p712_p8 = scmp.ne.s32.totalorder %s458_s30, %s711_s5  ;;  %s805_s12 = smov [#allocation7]  }
  0x42   : > { %s715_s15 = sshll.u32 %s805_s12, 4  ;;  %s716_s15 = int_to_ptr.vmem [resolvable:$false] %s715_s15 }
  0x43   : > { %p713_p0 = pnand %p712_p8, %p872_p9  ;;  %s717_s18 = scalar_lea.vmem %s716_s15, 256 }
  0x44   : > { %p718_p13 = scmp.lt.s32.totalorder %s458_s30, %s716_s15  ;;  %p719_p5 = scmp.lt.s32.totalorder %s717_s18, %s711_s5 }
  0x45   : > { %p714_p3 = pneg %p713_p0 }
  0x46   : > { %p720_p12 = por %p719_p5, %p718_p13 }
  0x48   : > { %p721_p6 = pnand %p720_p12, %p714_p3 }
  0x4d   : > { %v652_v3 = vpop.eup %651 }
  0x4e   : > { %289 = vrot.lane.b32.xlu1 %v652_v3, %s799_s26  ;;  %222 = vrot.lane.b32.xlu0 %v652_v3, %s800_s27 }
  0x52   : > { %322 = vrot.lane.b32.xlu1 %v652_v3, %s801_s28  ;;  %256 = vrot.lane.b32.xlu0 %v652_v3, %s802_s29 }
  0x56   : > { %355 = vrot.lane.b32.xlu0 %v652_v3, %s803_s3  ;;  %388 = vrot.lane.b32.xlu1 %v652_v3, %s804_s7 }
  0x5a   : > { %247 = vrot.lane.b32.xlu0 %v950_v4, %s800_s27  ;;  %280 = vrot.lane.b32.xlu1 %v950_v4, %s802_s29 }
  0x5e   : > { %313 = vrot.lane.b32.xlu0 %v950_v4, %s799_s26 }
  0xc0   : > { %v290_v7 = vpop.permute.xlu1 %289  ;;  %v223_v8 = vpop.permute.xlu0 %222 }
  0xc1   : > { %v224_v9 = vrot.slane %v223_v8, 7  ;;  %v291_v16 = vrot.slane %v290_v7, 7 }
  0xc3   : > { %v226_v12 = vsel %vm225_vm0, %v224_v9, %v223_v8  ;;  %v293_v28 = vsel %vm292_vm3, %v291_v16, %v290_v7 }
  0xc4   : > { %v228_v13 = vmul.f32 %v652_v3, %v226_v12  ;;  %v323_v14 = vpop.permute.xlu1 %322  ;;  %v257_v15 = vpop.permute.xlu0 %256 }
  0xc5   : > { %v324_v17 = vrot.slane %v323_v14, 1  ;;  %v258_v18 = vrot.slane %v257_v15, 7 }
  0xc6   : > { %v238_v19 = vrot.slane %v228_v13, %v958_v11  ;;  %v234_v20 = vrot.slane %v228_v13, %v956_v10  ;;  %v255_v23 = vadd.f32 1.0, %v228_v13 }
  0xc7   : > { %v326_v21 = vsel %vm325_vm1, %v323_v14, %v324_v17  ;;  %v260_v22 = vsel %vm259_vm2, %v258_v18, %v257_v15 }
  0xc8   : > { %v328_v24 = vmul.f32 %v652_v3, %v326_v21  ;;  %v262_v25 = vmul.f32 %v260_v22, %v228_v13  ;;  %v356_v26 = vpop.permute.xlu0 %355  ;;  %241 = vrot.lane.b32.xlu1 %v238_v19, %s804_s7  ;;  %239 = vrot.lane.b32.xlu0 %v234_v20, %s804_s7  ;;  %v389_v27 = vpop.permute.xlu1 %388 }
  0xc9   : > { %v357_v29 = vrot.slane %v356_v26, 1  ;;  %v390_v30 = vrot.slane %v389_v27, 1 }
  0xca   : > { %v288_v31 = vadd.f32 %v262_v25, %v255_v23  ;;  %v295_v32 = vmul.f32 %v293_v28, %v262_v25  ;;  %v338_v33 = vrot.slane %v328_v24, %v958_v11  ;;  %v334_v34 = vrot.slane %v328_v24, %v956_v10 }
  0xcb   : > { %v359_v35 = vsel %vm358_vm4, %v356_v26, %v357_v29  ;;  %v391_v38 = vsel %vm243_vm5, %v389_v27, %v390_v30  ;;  %v272_v40 = vrot.slane %v262_v25, %v958_v11  ;;  %v268_v41 = vrot.slane %v262_v25, %v956_v10 }
  0xcc   : > { %v321_v36 = vadd.f32 %v295_v32, %v288_v31  ;;  %v361_v37 = vmul.f32 %v359_v35, %v328_v24  ;;  %341 = vrot.lane.b32.xlu1 %v338_v33, %s804_s7  ;;  %339 = vrot.lane.b32.xlu0 %v334_v34, %s804_s7  ;;  %v301_v48 = vrot.slane %v295_v32, %v956_v10  ;;  %v248_v58 = vpop.permute.xlu0 %247  ;;  %v281_v59 = vpop.permute.xlu1 %280 }
  0xcd   : > { %v305_v49 = vrot.slane %v295_v32, %v958_v11 }
  0xce   : > { %v354_v39 = vadd.f32 %v328_v24, %v321_v36  ;;  %v393_v43 = vmul.f32 %v391_v38, %v361_v37  ;;  %v367_v45 = vrot.slane %v361_v37, %v956_v10  ;;  %v371_v46 = vrot.slane %v361_v37, %v958_v11 }
  0xd0   : > { %v387_v42 = vadd.f32 %v361_v37, %v354_v39  ;;  %275 = vrot.lane.b32.xlu1 %v272_v40, %s804_s7  ;;  %273 = vrot.lane.b32.xlu0 %v268_v41, %s804_s7  ;;  %v399_v50 = vrot.slane %v393_v43, %v956_v10  ;;  %v403_v51 = vrot.slane %v393_v43, %v958_v11  ;;  %v314_v60 = vpop.permute.xlu0 %313 }
  0xd2   : > { %v419_v44 = vadd.f32 %v393_v43, %v387_v42 }
  0xd4   : > { %v420_v47 = vadd.f32 4.539993e-05, %v419_v44  ;;  %372 = vrot.lane.b32.xlu1 %v367_v45, %s804_s7  ;;  %374 = vrot.lane.b32.xlu0 %v371_v46, %s804_s7 }
  0xd6   : > { %653 = vrcp.f32 %v420_v47 }
  0xd8   : > { %306 = vrot.lane.b32.xlu1 %v301_v48, %s804_s7  ;;  %308 = vrot.lane.b32.xlu0 %v305_v49, %s804_s7 }
  0xdc   : > { %346 = vrot.lane.b32.xlu1 %v950_v4, %s801_s28  ;;  %404 = vrot.lane.b32.xlu0 %v399_v50, %s804_s7 }
  0xe0   : > { %406 = vrot.lane.b32.xlu1 %v403_v51, %s804_s7  ;;  %379 = vrot.lane.b32.xlu0 %v950_v4, %s803_s3 }
  0xe3   : > { %v654_v52 = vpop.eup %653 }
  0xe4   : > { %411 = vrot.lane.b32.xlu1 %v950_v4, %s804_s7  ;;  %v422_v53 = vmul.f32 %v654_v52, %v420_v47 }
  0xe6   : > { %v423_v54 = vsub.f32 2.0, %v422_v53 }
  0xe8   : > { %v424_v55 = vmul.f32 %v654_v52, %v423_v54 }
  0xea   : > { %v433_v56 = vrot.slane %v424_v55, %v958_v11  ;;  %v429_v57 = vrot.slane %v424_v55, %v956_v10 }
  0xec   : > { %436 = vrot.lane.b32.xlu1 %v433_v56, %s804_s7  ;;  %434 = vrot.lane.b32.xlu0 %v429_v57, %s804_s7 }
 0x13a   : > { %v242_v61 = vpop.permute.xlu1 %241  ;;  %v240_v62 = vpop.permute.xlu0 %239 }
 0x13b   : > { %v244_v2 = vsel %vm243_vm5, %v240_v62, %v242_v61 }
 0x13c   : > { %v246_v8 = vsel %vm229_vm6, %v244_v2, 0.0 }
 0x13d   : > { %v252_v13 = vrot.slane %v246_v8, %v956_v10 }
 0x13e   : > { %v342_v0 = vpop.permute.xlu1 %341  ;;  %v340_v1 = vpop.permute.xlu0 %339 }
 0x13f   : > { %v253_v17 = vmul.f32 %v252_v13, %v248_v58  ;;  %v343_v20 = vsel %vm243_vm5, %v340_v1, %v342_v0 }
 0x140   : > { %v345_v27 = vsel %vm329_vm9, %v343_v20, 0.0 }
 0x141   : > { %v254_v24 = vadd.f32 %v253_v17, %v950_v4  ;;  %v351_v33 = vrot.slane %v345_v27, %v956_v10 }
 0x142   : > { %v276_v3 = vpop.permute.xlu1 %275  ;;  %v274_v6 = vpop.permute.xlu0 %273 }
 0x143   : > { %v277_v7 = vsel %vm243_vm5, %v274_v6, %v276_v3 }
 0x144   : > { %v279_v12 = vsel %vm263_vm7, %v277_v7, 0.0 }
 0x145   : > { %v285_v14 = vrot.slane %v279_v12, %v956_v10 }
 0x146   : > { %v373_v9 = vpop.permute.xlu1 %372  ;;  %v375_v11 = vpop.permute.xlu0 %374 }
 0x147   : > { %v286_v21 = vmul.f32 %v285_v14, %v281_v59  ;;  %v376_v25 = vsel %vm243_vm5, %v373_v9, %v375_v11 }
 0x148   : > { %v378_v30 = vsel %vm362_vm10, %v376_v25, 0.0 }
 0x149   : > { %v287_v28 = vadd.f32 %v286_v21, %v254_v24  ;;  %v384_v4 = vrot.slane %v378_v30, %v956_v10 }
 0x14a   : > { %v307_v5 = vpop.permute.xlu1 %306  ;;  %v309_v15 = vpop.permute.xlu0 %308 }
 0x14b   : > { %v310_v16 = vsel %vm243_vm5, %v307_v5, %v309_v15 }
 0x14c   : > { %v312_v18 = vsel %vm296_vm8, %v310_v16, 0.0 }
 0x14d   : > { %v318_v19 = vrot.slane %v312_v18, %v956_v10 }
 0x14e   : > { %v347_v22 = vpop.permute.xlu1 %346  ;;  %v405_v23 = vpop.permute.xlu0 %404 }
 0x14f   : > { %v319_v26 = vmul.f32 %v318_v19, %v314_v60  ;;  %v352_v36 = vmul.f32 %v351_v33, %v347_v22 }
 0x151   : > { %v320_v32 = vadd.f32 %v319_v26, %v287_v28 }
 0x152   : > { %v407_v29 = vpop.permute.xlu1 %406  ;;  %v380_v35 = vpop.permute.xlu0 %379 }
 0x153   : > { %v408_v31 = vsel %vm243_vm5, %v405_v23, %v407_v29  ;;  %v353_v39 = vadd.f32 %v352_v36, %v320_v32  ;;  %v385_v40 = vmul.f32 %v384_v4, %v380_v35 }
 0x154   : > { %v410_v34 = vsel %vm394_vm11, %v408_v31, 0.0 }
 0x155   : > { %v416_v37 = vrot.slane %v410_v34, %v956_v10  ;;  %v386_v42 = vadd.f32 %v385_v40, %v353_v39 }
 0x156   : > { %v412_v38 = vpop.permute.xlu1 %411 }
 0x157   : > { %v417_v41 = vmul.f32 %v416_v37, %v412_v38 }
 0x159   : > { %v418_v43 = vadd.f32 %v417_v41, %v386_v42 }
 0x15e   : > { %v437_v44 = vpop.permute.xlu1 %436  ;;  %v435_v45 = vpop.permute.xlu0 %434 }
 0x15f   : > { %v438_v46 = vsel %vm243_vm5, %v435_v45, %v437_v44 }
 0x160   : > { %v440_v47 = vmul.f32 %v438_v46, %v418_v43 }
 0x162   : > { %441 = vst [vmem:[%s213_s8] sm:$0xff] %v440_v47 }
 0x163   : > { %724 = shalt.err (!%p721_p6)
}
 0x164   : > { %s725_s20 = scalar_lea.hbm %s455_s16, 128  ;;  %s729_s27 = scalar_lea.hbm %s1054_s2, 256 }
 0x165   : > { %p726_p7 = scmp.ne.s32.totalorder %s455_s16, %s725_s20  ;;  %p730_p4 = scmp.lt.s32.totalorder %s455_s16, %s1054_s2 }
 0x166   : > { %p731_p10 = scmp.lt.s32.totalorder %s729_s27, %s725_s20 }
 0x167   : > { %p727_p1 = pnand %p726_p7, %p872_p9 }
 0x168   : > { %p732_p8 = por %p731_p10, %p730_p4 }
 0x169   : > { %p728_p2 = pneg %p727_p1 }
 0x16b   : > { %p733_p0 = pnand %p732_p8, %p728_p2 }
 0x16d   : > { %736 = shalt.err (!%p733_p0)
}
 0x16e   : > { %582 = dma.vmem_to_hbm [thread:$0]  (%p872_p9), %s458_s30, 128, %s455_s16, %s443_s19  }
 0x16f PF: > { %s469_s3 = sand.u32 1, %s775_s9   ;;  %p1061_p3 = scmp.ge.s32.totalorder %s795_s14, 2 }
 0x170   : > { %s470_s7 = scalar_lea.sflag [#allocation4], %s469_s3 }
 0x171   : > { %p592_p13 = pnand %p1061_p3, %p879_p11 }
 0x173   : > { %p593_p5 = pneg %p592_p13 }
 0x175   : > { %770 = dma.done.wait (%p593_p5), %s470_s7, 128  }
 0x176   : > { %772 = vsyncadd (%p593_p5), %s470_s7, 4294967168  ;;  %s21_s14 = sadd.s32 1, %s795_s14   ;;  %s1062_s9 = smov %s779_s10 }
 0x177   : > { %p18_p12 = scmp.ge.s32.totalorder %s21_s14, 4   ;;  %s1063_s10 = smov %s783_s11 }
 0x178   : > { %s1064_s11 = smov %s877_s23  ;;  %s1065_s12 = smov %s791_s13 }
 0x179   : > { %s1066_s13 = smov %s1068_s17  ;;  %20 = sbr.rel (!%p18_p12) target bundleno = 8 (0x8), region = 86 }
 0x17e   :  { %475 = vsyncpa [#allocation3], 1 }
 0x17f   :  { %477 = vsyncpa [#allocation3 + $0x1], 1 }
 0x180   :  { %478 = vsyncpa [#allocation6], 1 }
 0x181   :  { %480 = vsyncpa [#allocation6 + $0x1], 1 }
 0x182   :  { %481 = vsyncpa [#allocation4], 1 }
 0x183   :  { %483 = vsyncpa [#allocation4 + $0x1], 1 }

</bundles_post_ra>
